<compile_context>
chip_gen: v7x
topology: tpu7x:2x2x1
jax: 0.10.0
libtpu: 0.0.40
codegen_flags: <defaults>
</compile_context>

<pallas_src>
import jax
import jax.numpy as jnp
from jax import lax
from jax.experimental import pallas as pl
from jax.experimental.pallas import tpu as pltpu


def sae_kernel(x_ref, we_ref, be_ref, wd_ref, bd_ref, enc_ref, dec_ref, acc_ref):
    """Grid: (batch tile b [parallel], hidden tile h [arbitrary, innermost]).

    Per (b, h) step:
      enc_tile = relu(x_b @ W_enc[h_rows, :].T + b_enc[h_rows])   -> encoded output
      acc_b   += enc_tile @ W_dec[:, h_cols].T                    -> f32 VMEM scratch
    Decoder bias folded into h == 0; decoded output written at the last h step.
    """
    h = pl.program_id(1)
    nh = pl.num_programs(1)

    # Encoder tile: NT matmul against the PyTorch-layout (th, D) weight rows.
    z = lax.dot_general(
        x_ref[...], we_ref[...],
        dimension_numbers=(((1,), (1,)), ((), ())),
        preferred_element_type=jnp.float32,
        precision=lax.Precision.DEFAULT)
    enc = jnp.maximum(z + be_ref[...], 0.0)          # be block (1, th) broadcasts
    enc_ref[...] = enc.astype(enc_ref.dtype)

    # Decoder contribution: NT matmul against the (D, th) weight columns.
    contrib = lax.dot_general(
        enc.astype(wd_ref.dtype), wd_ref[...],
        dimension_numbers=(((1,), (1,)), ((), ())),
        preferred_element_type=jnp.float32,
        precision=lax.Precision.DEFAULT)

    @pl.when(h == 0)
    def _():
        acc_ref[...] = contrib + bd_ref[...]

    @pl.when(h > 0)
    def _():
        acc_ref[...] += contrib

    @pl.when(h == nh - 1)
    def _():
        dec_ref[...] = acc_ref[...].astype(dec_ref.dtype)


def _vmem_capacity_bytes():
    """Per-core VMEM capacity; conservative 64 MiB fallback if query fails."""
    try:
        info = pltpu.get_tpu_info()
        cap = getattr(info, "vmem_capacity_bytes", None)
        if cap:
            return int(cap)
    except Exception:
        pass
    return 64 << 20


def _vmem_estimate_bytes(tb, D, th, wbytes, weight_bufs=2):
    """Rough VMEM footprint (double-buffered streams + resident blocks + scratch)."""
    f32 = 4
    return int(
        2 * tb * D * wbytes            # x tile (double-buffered)
        + 2 * tb * th * f32            # encoded output tile (double-buffered)
        + 2 * tb * D * f32             # decoded output block
        + weight_bufs * th * D * wbytes  # W_enc row tile
        + weight_bufs * D * th * wbytes  # W_dec column tile
        + 2 * 8 * th * f32             # b_enc tile (sublane-padded)
        + 2 * 8 * D * f32              # b_dec (resident)
        + tb * D * f32                 # f32 decoder accumulator scratch
    )


def _pick_tiles(B, D, H, vmem_budget, wbytes, multi_tc, weight_bufs):
    """Pick (tb, th). Prefer the largest tb that still allows th >= 256; on
    multi-TensorCore parts (v7x) keep tb <= B/2 so both cores get batch tiles."""
    tb_candidates = [512, 384, 256, 192, 128, 64, 32, 16, 8]
    if multi_tc:
        cap = max(B // 2, 8)
        tb_candidates = [c for c in tb_candidates if c <= cap] or [8]
    th_candidates = [4096, 2048, 1024, 512, 256, 128]

    fallback = None
    for tb in tb_candidates:
        if tb > B or B % tb != 0:
            continue
        for th in th_candidates:
            if H % th != 0:
                continue
            if _vmem_estimate_bytes(tb, D, th, wbytes, weight_bufs) <= vmem_budget:
                if th >= 256:
                    return tb, th
                if fallback is None:
                    fallback = (tb, th)
                break  # th candidates are descending; try a smaller tb for bigger th
    if fallback is not None:
        return fallback
    # Last resort: smallest legal tiles.
    tb = 8 if (B % 8 == 0 and B >= 8) else B
    th = 128 if H % 128 == 0 else H
    return tb, th


def sparse_autoencoder_forward(x, W_enc, b_enc, W_dec, b_dec, *,
                               tb=None, th=None, compute_dtype=None,
                               weight_buffers=2):
    """x: (B, D). W_enc: (H, D), b_enc: (H,), W_dec: (D, H), b_dec: (D,)
    — all in PyTorch nn.Linear layout, no transposes. Returns (encoded, decoded),
    both float32. compute_dtype=jnp.bfloat16 enables the reduced-bandwidth path
    (f32 accumulation, f32 outputs)."""
    B, D = x.shape
    H, D2 = W_enc.shape
    assert D2 == D and W_dec.shape == (D, H)
    assert b_enc.shape == (H,) and b_dec.shape == (D,)
    assert D % 128 == 0 and H % 128 == 0, "shapes must be lane-aligned"

    compute_dtype = jnp.dtype(compute_dtype) if compute_dtype is not None else jnp.dtype(x.dtype)
    assert compute_dtype in (jnp.dtype(jnp.float32), jnp.dtype(jnp.bfloat16))
    wbytes = compute_dtype.itemsize
    assert weight_buffers in (2, 3)

    # Generation-aware VMEM sizing.
    cap = _vmem_capacity_bytes()
    multi_tc = cap <= (80 << 20)          # v7x-class part: 64 MiB / core, 2 cores
    vmem_budget = int(cap * 0.78)

    auto_tb, auto_th = _pick_tiles(B, D, H, vmem_budget, wbytes, multi_tc,
                                   weight_buffers)
    if tb is None:
        tb = auto_tb
    if th is None:
        th = auto_th
    assert B % tb == 0 and (tb == B or tb % 8 == 0)
    assert H % th == 0 and th % 128 == 0

    est = _vmem_estimate_bytes(tb, D, th, wbytes, weight_buffers)
    # >=15% headroom below physical capacity (matters on v7x's 64 MiB).
    vmem_limit = int(min(max(est * 5 // 4, 32 << 20), int(cap * 0.85)))

    xc = x.astype(compute_dtype)
    we = W_enc.astype(compute_dtype)
    wd = W_dec.astype(compute_dtype)
    be = b_enc.astype(jnp.float32).reshape(1, H)
    bd = b_dec.astype(jnp.float32).reshape(1, D)

    w_mode = pl.Buffered(weight_buffers) if weight_buffers != 2 else None
    grid = (B // tb, H // th)

    enc_out, dec_out = pl.pallas_call(
        sae_kernel,
        out_shape=(
            jax.ShapeDtypeStruct((B, H), jnp.float32),   # encoded
            jax.ShapeDtypeStruct((B, D), jnp.float32),   # decoded
        ),
        grid_spec=pltpu.PrefetchScalarGridSpec(
            num_scalar_prefetch=0,
            grid=grid,
            in_specs=[
                pl.BlockSpec((tb, D), lambda b, h: (b, 0)),   # x (constant over h)
                pl.BlockSpec((th, D), lambda b, h: (h, 0),    # W_enc row tile (contiguous)
                             pipeline_mode=w_mode),
                pl.BlockSpec((1, th), lambda b, h: (0, h)),   # b_enc tile
                pl.BlockSpec((D, th), lambda b, h: (0, h),    # W_dec column tile
                             pipeline_mode=w_mode),
                pl.BlockSpec((1, D), lambda b, h: (0, 0)),    # b_dec (resident)
            ],
            out_specs=[
                pl.BlockSpec((tb, th), lambda b, h: (b, h)),  # encoded tile
                pl.BlockSpec((tb, D), lambda b, h: (b, 0)),   # decoded (written at last h)
            ],
            scratch_shapes=[pltpu.VMEM((tb, D), jnp.float32)],  # f32 decoder accumulator
        ),
        compiler_params=pltpu.CompilerParams(
            dimension_semantics=("parallel", "arbitrary"),
            vmem_limit_bytes=vmem_limit,
        ),
    )(xc, we, be, wd, bd)
    return enc_out, dec_out


if __name__ == "__main__":
    # Small hardware-friendly shapes: input_dim=128, expansion_factor=4 -> hidden=512.
    B, D, EXP = 16, 128, 4
    H = D * EXP

    key = jax.random.PRNGKey(0)
    kx, kwe, kbe, kwd, kbd = jax.random.split(key, 5)

    x = jax.random.normal(kx, (B, D), dtype=jnp.float32)
    # Deterministic synthetic params in PyTorch nn.Linear layout: weight (out, in), bias (out,)
    W_enc = jax.random.normal(kwe, (H, D), dtype=jnp.float32) * 0.02
    b_enc = jax.random.normal(kbe, (H,), dtype=jnp.float32) * 0.01
    W_dec = jax.random.normal(kwd, (D, H), dtype=jnp.float32) * 0.02
    b_dec = jax.random.normal(kbd, (D,), dtype=jnp.float32) * 0.01

    # Pure-JAX reference of the forward semantics.
    enc_ref = jnp.maximum(x @ W_enc.T + b_enc, 0.0)
    dec_ref = enc_ref @ W_dec.T + b_dec

    # 1) Explicit small tiles: tb=8, th=128 -> grid (2, 4), exercising the
    #    parallel batch axis, the multi-step hidden reduction, bias fold and the
    #    last-step decoded writeback.
    enc, dec = sparse_autoencoder_forward(x, W_enc, b_enc, W_dec, b_dec, tb=8, th=128)
    enc, dec = jax.block_until_ready((enc, dec))
    assert jnp.allclose(enc, enc_ref, atol=1e-3, rtol=1e-3)
    assert jnp.allclose(dec, dec_ref, atol=1e-3, rtol=1e-3)

    # 2) Auto-picked tiles (generation-aware VMEM budget / MXU-friendly th).
    enc2, dec2 = sparse_autoencoder_forward(x, W_enc, b_enc, W_dec, b_dec)
    enc2, dec2 = jax.block_until_ready((enc2, dec2))
    assert jnp.allclose(enc2, enc_ref, atol=1e-3, rtol=1e-3)
    assert jnp.allclose(dec2, dec_ref, atol=1e-3, rtol=1e-3)

    print("KERNEL_OK")
</pallas_src>

<mosaic_0001>
module attributes {stable_mosaic.version = 11 : i64} {
  func.func @sae_kernel(%arg0: i32, %arg1: i32, %arg2: memref<8x128xf32, #tpu.memory_space<vmem>>, %arg3: memref<128x128xf32, #tpu.memory_space<vmem>>, %arg4: memref<1x128xf32, #tpu.memory_space<vmem>>, %arg5: memref<128x128xf32, #tpu.memory_space<vmem>>, %arg6: memref<1x128xf32, #tpu.memory_space<vmem>>, %arg7: memref<8x128xf32, #tpu.memory_space<vmem>>, %arg8: memref<8x128xf32, #tpu.memory_space<vmem>>, %arg9: memref<8x128xf32, #tpu.memory_space<vmem>>) attributes {dimension_semantics = [#tpu.dimension_semantics<parallel>, #tpu.dimension_semantics<arbitrary>], iteration_bounds = array<i64: 2, 4>, scalar_prefetch = 0 : i64, scratch_operands = 1 : i64, tpu.core_type = #tpu.core_type<tc>, window_params = [{transform_indices = @transform_0, window_bounds = array<i64: 8, 128>}, {transform_indices = @transform_1, window_bounds = array<i64: 128, 128>}, {transform_indices = @transform_2, window_bounds = array<i64: 1, 128>}, {transform_indices = @transform_3, window_bounds = array<i64: 128, 128>}, {pipeline_mode = #tpu.pipeline_mode<synchronous>, transform_indices = @transform_4, window_bounds = array<i64: 1, 128>}, {transform_indices = @transform_5, window_bounds = array<i64: 8, 128>}, {transform_indices = @transform_6, window_bounds = array<i64: 8, 128>}]} {
    %c0 = arith.constant 0 : index
    %c0_0 = arith.constant 0 : index
    %0 = vector.load %arg2[%c0, %c0_0] : memref<8x128xf32, #tpu.memory_space<vmem>>, vector<8x128xf32>
    %c0_1 = arith.constant 0 : index
    %c0_2 = arith.constant 0 : index
    %1 = vector.load %arg3[%c0_1, %c0_2] : memref<128x128xf32, #tpu.memory_space<vmem>>, vector<128x128xf32>
    %cst = arith.constant dense<0.000000e+00> : vector<8x128xf32>
    %2 = tpu.matmul %0, %1, %cst {dimension_numbers = #tpu.dot_dimension_numbers<[1], [1], [0], [0], [0, 0, 1, 0], [], []>} : vector<8x128xf32>, vector<128x128xf32>, vector<8x128xf32> -> vector<8x128xf32>
    %c0_3 = arith.constant 0 : index
    %c0_4 = arith.constant 0 : index
    %3 = vector.load %arg4[%c0_3, %c0_4] : memref<1x128xf32, #tpu.memory_space<vmem>>, vector<1x128xf32>
    %4 = vector.broadcast %3 : vector<1x128xf32> to vector<8x128xf32>
    %5 = arith.addf %2, %4 : vector<8x128xf32>
    %cst_5 = arith.constant 0.000000e+00 : f32
    %6 = vector.broadcast %cst_5 : f32 to vector<8x128xf32>
    %7 = arith.maximumf %5, %6 : vector<8x128xf32>
    %c0_6 = arith.constant 0 : index
    %c0_7 = arith.constant 0 : index
    %8 = vector.load %arg7[%c0_6, %c0_7] : memref<8x128xf32, #tpu.memory_space<vmem>>, vector<8x128xf32>
    tpu.vector_store %arg7[%c0_6, %c0_7], %7 {strides = array<i32>} : memref<8x128xf32, #tpu.memory_space<vmem>>, vector<8x128xf32>,
    %c0_8 = arith.constant 0 : index
    %c0_9 = arith.constant 0 : index
    %9 = vector.load %arg5[%c0_8, %c0_9] : memref<128x128xf32, #tpu.memory_space<vmem>>, vector<128x128xf32>
    %cst_10 = arith.constant dense<0.000000e+00> : vector<8x128xf32>
    %10 = tpu.matmul %7, %9, %cst_10 {dimension_numbers = #tpu.dot_dimension_numbers<[1], [1], [0], [0], [0, 0, 1, 0], [], []>} : vector<8x128xf32>, vector<128x128xf32>, vector<8x128xf32> -> vector<8x128xf32>
    %c0_i32 = arith.constant 0 : i32
    %11 = arith.cmpi eq, %arg1, %c0_i32 : i32
    %12 = arith.extui %11 : i1 to i32
    %c0_i32_11 = arith.constant 0 : i32
    %13 = arith.cmpi ne, %12, %c0_i32_11 : i32
    scf.if %13 {
      %c0_15 = arith.constant 0 : index
      %c0_16 = arith.constant 0 : index
      %20 = vector.load %arg6[%c0_15, %c0_16] : memref<1x128xf32, #tpu.memory_space<vmem>>, vector<1x128xf32>
      %21 = vector.broadcast %20 : vector<1x128xf32> to vector<8x128xf32>
      %22 = arith.addf %10, %21 : vector<8x128xf32>
      %c0_17 = arith.constant 0 : index
      %c0_18 = arith.constant 0 : index
      %23 = vector.load %arg9[%c0_17, %c0_18] : memref<8x128xf32, #tpu.memory_space<vmem>>, vector<8x128xf32>
      tpu.vector_store %arg9[%c0_17, %c0_18], %22 {strides = array<i32>} : memref<8x128xf32, #tpu.memory_space<vmem>>, vector<8x128xf32>,
    } else {
    }
    %c0_i32_12 = arith.constant 0 : i32
    %14 = arith.cmpi sgt, %arg1, %c0_i32_12 : i32
    %15 = arith.extui %14 : i1 to i32
    %c0_i32_13 = arith.constant 0 : i32
    %16 = arith.cmpi ne, %15, %c0_i32_13 : i32
    scf.if %16 {
      %c0_15 = arith.constant 0 : index
      %c0_16 = arith.constant 0 : index
      %20 = vector.load %arg9[%c0_15, %c0_16] : memref<8x128xf32, #tpu.memory_space<vmem>>, vector<8x128xf32>
      %21 = arith.addf %20, %10 : vector<8x128xf32>
      %c0_17 = arith.constant 0 : index
      %c0_18 = arith.constant 0 : index
      %22 = vector.load %arg9[%c0_17, %c0_18] : memref<8x128xf32, #tpu.memory_space<vmem>>, vector<8x128xf32>
      tpu.vector_store %arg9[%c0_17, %c0_18], %21 {strides = array<i32>} : memref<8x128xf32, #tpu.memory_space<vmem>>, vector<8x128xf32>,
    } else {
    }
    %c3_i32 = arith.constant 3 : i32
    %17 = arith.cmpi eq, %arg1, %c3_i32 : i32
    %18 = arith.extui %17 : i1 to i32
    %c0_i32_14 = arith.constant 0 : i32
    %19 = arith.cmpi ne, %18, %c0_i32_14 : i32
    scf.if %19 {
      %c0_15 = arith.constant 0 : index
      %c0_16 = arith.constant 0 : index
      %20 = vector.load %arg9[%c0_15, %c0_16] : memref<8x128xf32, #tpu.memory_space<vmem>>, vector<8x128xf32>
      %c0_17 = arith.constant 0 : index
      %c0_18 = arith.constant 0 : index
      %21 = vector.load %arg8[%c0_17, %c0_18] : memref<8x128xf32, #tpu.memory_space<vmem>>, vector<8x128xf32>
      tpu.vector_store %arg8[%c0_17, %c0_18], %20 {strides = array<i32>} : memref<8x128xf32, #tpu.memory_space<vmem>>, vector<8x128xf32>,
    } else {
    }
    return
  }
  func.func @transform_0(%arg0: i32, %arg1: i32) -> (i32, i32) {
    %c0_i32 = arith.constant 0 : i32
    %c0_i32_0 = arith.constant 0 : i32
    return %arg0, %c0_i32 : i32, i32
  }
  func.func @transform_1(%arg0: i32, %arg1: i32) -> (i32, i32) {
    %c0_i32 = arith.constant 0 : i32
    %c0_i32_0 = arith.constant 0 : i32
    return %arg1, %c0_i32 : i32, i32
  }
  func.func @transform_2(%arg0: i32, %arg1: i32) -> (i32, i32) {
    %c0_i32 = arith.constant 0 : i32
    %c0_i32_0 = arith.constant 0 : i32
    return %c0_i32, %arg1 : i32, i32
  }
  func.func @transform_3(%arg0: i32, %arg1: i32) -> (i32, i32) {
    %c0_i32 = arith.constant 0 : i32
    %c0_i32_0 = arith.constant 0 : i32
    return %c0_i32, %arg1 : i32, i32
  }
  func.func @transform_4(%arg0: i32, %arg1: i32) -> (i32, i32) {
    %c0_i32 = arith.constant 0 : i32
    %c0_i32_0 = arith.constant 0 : i32
    %c0_i32_1 = arith.constant 0 : i32
    return %c0_i32, %c0_i32_0 : i32, i32
  }
  func.func @transform_5(%arg0: i32, %arg1: i32) -> (i32, i32) {
    %c0_i32 = arith.constant 0 : i32
    return %arg0, %arg1 : i32, i32
  }
  func.func @transform_6(%arg0: i32, %arg1: i32) -> (i32, i32) {
    %c0_i32 = arith.constant 0 : i32
    %c0_i32_0 = arith.constant 0 : i32
    return %arg0, %c0_i32 : i32, i32
  }
}

</mosaic_0001>

<bundles_post_ra>
// kernel: tpu_custom_call.1
= control target key start
LH: loop header
LB: loop body
LE: loop exit
PB: predicated region body
PF: predicated region fallthrough
CT: control target
= control target key end

     0   :  { %s1937_s0 = inlined_call_operand.hbm [shape: f32[16,128], index: 0, kind: input, shape index: {}]   ;;  %s1938_s1 = inlined_call_operand.hbm [shape: f32[512,128], index: 1, kind: input, shape index: {}]   ;;  %s1939_s2 = inlined_call_operand.vmem [shape: f32[1,512], index: 2, kind: input, shape index: {}]   ;;  %s1940_s3 = inlined_call_operand.hbm [shape: f32[128,512], index: 3, kind: input, shape index: {}]   ;;  %s1941_s4 = inlined_call_operand.vmem [shape: f32[1,128], index: 4, kind: input, shape index: {}]   ;;  %s1942_s5 = inlined_call_operand.hbm [shape: f32[16,512], index: 5, kind: output, shape index: {0}]   ;;  %s1943_s6 = inlined_call_operand.hbm [shape: f32[16,128], index: 6, kind: output, shape index: {1}]  }
   0x1   :  { %1968 = sst [smem:[#allocation31_spill]] %s1938_s1 }
   0x2   :  { %1969 = sst [smem:[#allocation32_spill]] %s1939_s2 }
   0x3   :  { %1970 = sst [smem:[#allocation33_spill]] %s1941_s4 }
   0x4   :  { %1971 = sst [smem:[#allocation34_spill]] %s1942_s5 }
   0x5   :  { %1972 = sst [smem:[#allocation35_spill]] %s1943_s6 }
   0x6   :  { %12 = vsyncpa [#allocation4], 0 }
   0x7   :  { %14 = vsyncpa [#allocation4 + $0x1], 0 }
   0x8   :  { %15 = vsyncpa [#allocation7], 0 }
   0x9   :  { %17 = vsyncpa [#allocation7 + $0x1], 0 }
   0xa   :  { %18 = vsyncpa [#allocation5], 0 }
   0xb   :  { %20 = vsyncpa [#allocation5 + $0x1], 0 }
   0xc   :  { %21 = vsyncpa [#allocation11], 0 }
   0xd   :  { %23 = vsyncpa [#allocation11 + $0x1], 0  ;;  %s1441_s21 = smov 0   ;;  %s1443_s22 = smov 0  }
   0xe   :  { %s1445_s23 = smov 0   ;;  %s1447_s24 = smov 0  }
   0xf   :  { %s1449_s25 = smov 0   ;;  %s1451_s26 = smov 0  }
  0x10   :  { %s1453_s27 = smov 0   ;;  %s1455_s28 = smov 0  }
  0x11   :  { %s1457_s29 = smov 0   ;;  %s1459_s30 = smov 0  }
  0x12   :  { %s1461_s7 = smov 0   ;;  %s1463_s8 = smov 0  }
  0x13   :  { %s1465_s9 = smov 0   ;;  %s1467_s10 = smov 0  }
  0x14 LB: > { %1973 = sst [smem:[#allocation16_spill]] %s1349_s23  ;;  %p56_p0 = scmp.eq.s32.totalorder %s1393_s10, 0  ;;  %s1393_s10 = sphi %s1467_s10, %s29_s10   ;;  %s1389_s9 = sphi %s1465_s9, %s2038_s9   ;;  %s1385_s8 = sphi %s1463_s8, %s2037_s8   ;;  %s1381_s7 = sphi %s1461_s7, %s2036_s7   ;;  %s1377_s30 = sphi %s1459_s30, %s2035_s30   ;;  %s1373_s29 = sphi %s1457_s29, %s2034_s29   ;;  %s1369_s28 = sphi %s1455_s28, %s2045_s28   ;;  %s1365_s27 = sphi %s1453_s27, %s2044_s27   ;;  %s1361_s26 = sphi %s1451_s26, %s2043_s26   ;;  %s1357_s25 = sphi %s1449_s25, %s2042_s25   ;;  %s1353_s24 = sphi %s1447_s24, %s2041_s24   ;;  %s1349_s23 = sphi %s1445_s23, %s2030_s23   ;;  %s1345_s22 = sphi %s1443_s22, %s2040_s22   ;;  %s1341_s21 = sphi %s1441_s21, %s2039_s21  }
  0x15   : > { %1974 = sst [smem:[#allocation17_spill]] %s1361_s26  ;;  %p81_p1 = scmp.ne.s32.totalorder %s1361_s26, %s1357_s25 }
  0x16   : > { %1975 = sst [smem:[#allocation18_spill]] %s1365_s27  ;;  %p1946_p3 = scmp.lt.s32.totalorder %s1393_s10, 8 }
  0x17   : > { %1976 = sst [smem:[#allocation19_spill]] %s1373_s29  ;;  %p83_p4 = por %p81_p1, %p56_p0 }
  0x18   : > { %1977 = sst [smem:[#allocation20_spill]] %s1377_s30  ;;  %s259_s12 = sand.u32 1, %s1393_s10  }
  0x19   : > { %1978 = sst [smem:[#allocation21_spill]] %s1381_s7  ;;  %s261_s13 = sand.u32 1, %s1361_s26  }
  0x1a   : > { %1979 = sst [smem:[#allocation22_spill]] %s1385_s8  ;;  %s1522_s14 = sshll.u32 %s261_s13, 7 }
  0x1b   : > { %1980 = sst [smem:[#allocation23_spill]] %s1389_s9  ;;  %s821_s15 = sshll.u32 %s1385_s8, 11 }
  0x1c   : > { %s1981_s1 = sld [smem:[#allocation31_spill]]  ;;  %s263_s19 = scalar_lea.vmem [#allocation6], %s1522_s14 }
  0x1d   : > { %s270_s20 = sshll.u32 %s263_s19, 4  ;;  %p1533_p5 = pnand %p1946_p3, %p83_p4  ;;  %s1537_s20 = int_to_ptr.vmem [resolvable:$true] %s270_s20 }
  0x1e   : > { %s1539_s13 = scalar_lea.sflag [#allocation7], %s259_s12 }
  0x1f   : > { %p1954_p7 = pneg %p1533_p5 }
  0x22   : > { %s1528_s18 = scalar_lea.hbm %s1981_s1, %s821_s15  ;;  %s1126_s19 = scalar_lea.hbm %s1981_s1, 8192 }
  0x23   : > { %s1121_s16 = scalar_lea.hbm %s1528_s18, 2048  ;;  %p1127_p10 = scmp.lt.u32.totalorder %s1528_s18, %s1981_s1 }
  0x24   : > { %p1122_p6 = scmp.ne.s32.totalorder %s1528_s18, %s1121_s16  ;;  %p1128_p11 = scmp.lt.u32.totalorder %s1126_s19, %s1121_s16 }
  0x25   : > { %p1130_p13 = scmp.lt.u32.totalorder %s1121_s16, %s1528_s18 }
  0x26   : > { %p1124_p8 = pnand %p1954_p7, %p1122_p6  ;;  %p1129_p12 = por %p1128_p11, %p1127_p10 }
  0x28   : > { %p1125_p9 = pneg %p1124_p8  ;;  %p1131_p1 = por %p1130_p13, %p1129_p12 }
  0x2a   : > { %p1132_p4 = pnand %p1131_p1, %p1125_p9 }
  0x2c   : > { %1135 = shalt.err (!%p1132_p4)
}
  0x2d   : > { %s1136_s12 = scalar_lea.vmem %s1537_s20, 2048  ;;  %s1395_s15 = smov [#allocation6]  }
  0x2e   : > { %p1137_p6 = scmp.ne.s32.totalorder %s1537_s20, %s1136_s12  ;;  %s1141_s17 = sshll.u32 %s1395_s15, 4  ;;  %s1142_s17 = int_to_ptr.vmem [resolvable:$false] %s1141_s17 }
  0x2f   : > { %s1143_s5 = scalar_lea.vmem %s1142_s17, 4096  ;;  %p1144_p2 = scmp.lt.s32.totalorder %s1537_s20, %s1142_s17 }
  0x30   : > { %p1139_p8 = pnand %p1137_p6, %p1954_p7  ;;  %p1145_p10 = scmp.lt.s32.totalorder %s1143_s5, %s1136_s12 }
  0x32   : > { %p1140_p3 = pneg %p1139_p8  ;;  %p1146_p11 = por %p1145_p10, %p1144_p2 }
  0x34   : > { %p1147_p12 = pnand %p1146_p11, %p1140_p3 }
  0x36   : > { %1150 = shalt.err (!%p1147_p12)
}
  0x37   : > { %s1947_s6 = smov 128   ;;  %s1948_s16 = smov 8  }
  0x38   : > { %990 = dma.hbm_to_vmem [thread:$0]  (!%p1533_p5), %s1528_s18, 2048, %s1537_s20, %s1539_s13, %s1947_s6, %s1947_s6, %s1948_s16  }
  0x39   : > { %p803_p2 = scmp.ge.s32.totalorder %s1393_s10, 1  ;;  %s290_s19 = scalar_lea.vmem [#allocation8], %s1522_s14 }
  0x3a   : > { %s296_s12 = sshll.u32 %s290_s19, 4  ;;  %p304_p3 = scmp.lt.s32.totalorder %s1393_s10, 9  ;;  %s1573_s12 = int_to_ptr.vmem [resolvable:$true] %s296_s12 }
  0x3b   : > { %s1580_s17 = sadd.s32 4294967295, %s1393_s10   ;;  %s793_s18 = sadd.s32 4294967294, %s1393_s10  }
  0x3c   : > { %p1575_p9 = pnand %p803_p2, %p304_p3  ;;  %s38_s20 = sadd.s32 1, %s1385_s8 }
  0x3d   : > { %s41_s14 = sadd.s32 1, %s1389_s9  ;;  %p39_p13 = scmp.ge.s32.totalorder %s38_s20, 4 }
  0x3e   : > { %s1983_s15 = scalar_select %p1575_p9, 1, 0 }
  0x3f   : > { %s48_s5 = sadd.s32 1, %s1373_s29  ;;  %p55_p1 = scmp.ne.s32.totalorder %s1373_s29, %s1369_s28 }
  0x40   : > { %p1955_p4 = scmp.ne.s32.totalorder %s1369_s28, %s1365_s27  ;;  %s2047_s20 = smov (%p39_p13, %s38_s20), 0 }
  0x41   : > { %1984 = sst [smem:[#allocation24_spill]] %s2047_s20  ;;  %s2049_s14 = smov (!%p39_p13, %s41_s14), %s1389_s9 }
  0x42   : > { %p1598_p6 = por %p56_p0, %p55_p1  ;;  %p62_p8 = scmp.eq.s32.totalorder %s1580_s17, 0 }
  0x43   : > { %p43_p10 = scmp.ge.s32.totalorder %s2049_s14, 2  ;;  %s71_s6 = ssub.s32 %s1385_s8, %s2047_s20 }
  0x44   : > { %p1608_p11 = por %p62_p8, %p1955_p4  ;;  %p72_p12 = scmp.eq.s32.totalorder %s71_s6, 0 }
  0x45   : > { %s2051_s14 = smov (%p43_p10, %s2049_s14), 0  ;;  %s1989_s1 = sadd.s32 1, %s1361_s26 }
  0x46   : > { %s1986_s16 = scalar_select %p1608_p11, 1, 0 }
  0x47   : > { %1988 = sst [smem:[#allocation26_spill]] %s2051_s14  ;;  %s45_s4 = ssub.s32 %s1389_s9, %s2051_s14 }
  0x48   : > { %1987 = sst [smem:[#allocation25_spill]] %s1986_s16  ;;  %p1991_p0 = scmp.ne.s32.totalorder %s1357_s25, %s1353_s24 }
  0x49   : > { %s1617_s7 = scalar_select %p72_p12, %s1361_s26, %s1989_s1  }
  0x4a   : > { %p1624_p2 = por %p1991_p0, %p62_p8  ;;  %p46_p3 = scmp.eq.s32.totalorder %s45_s4, 0 }
  0x4b   : > { %1990 = sst [smem:[#allocation27_spill]] %s1617_s7  ;;  %s172_s2 = sor.u32 %s71_s6, %s45_s4 }
  0x4c   : > { %s1992_s20 = scalar_select %p1624_p2, 1, 0 }
  0x4d   : > { %p173_p13 = scmp.eq.s32.totalorder %s172_s2, 0  ;;  %s175_s30 = sadd.s32 1, %s1349_s23 }
  0x4e   : > { %s1630_s16 = scalar_select %p46_p3, %s1373_s29, %s48_s5  }
  0x4f   : > { %s1633_s1 = scalar_select %p173_p13, %s1349_s23, %s175_s30  }
  0x50   : > { %1993 = sst [smem:[#allocation28_spill]] %s1630_s16  ;;  %p185_p10 = scmp.ne.s32.totalorder %s1349_s23, %s1345_s22 }
  0x51   : > { %1994 = sst [smem:[#allocation29_spill]] %s1633_s1  ;;  %p186_p12 = scmp.eq.s32.totalorder %s1580_s17, 7 }
  0x52   : > { %p191_p7 = scmp.ne.s32.totalorder %s1345_s22, %s1341_s21  ;;  %p192_p4 = scmp.eq.s32.totalorder %s793_s18, 7 }
  0x53   : > { %p1640_p8 = por %p186_p12, %p185_p10  ;;  %p1647_p0 = por %p186_p12, %p55_p1 }
  0x54   : > { %p1651_p3 = por %p192_p4, %p191_p7  ;;  %p1998_p13 = scmp.ne.s32.totalorder %s1369_s28, %s1365_s27 }
  0x55   : > { %s1995_s24 = scalar_select %p1640_p8, 1, 0 }
  0x56   : > { %s1996_s4 = scalar_select %p1647_p0, 1, 0 }
  0x57   : > { %s1997_s2 = scalar_select %p1651_p3, 1, 0 }
  0x58   : > { %p1658_p2 = por %p192_p4, %p1998_p13  ;;  %s241_s6 = sand.u32 1, %s1373_s29  }
  0x59   : > { %s797_s18 = sshll.u32 %s1389_s9, 7  ;;  %s796_s5 = sshll.u32 %s241_s6, 3 }
  0x5a   : > { %s1999_s30 = scalar_select %p1658_p2, 1, 0 }
  0x5b   : > { %s1667_s7 = scalar_lea.hbm %s1937_s0, %s797_s18  ;;  %s245_s26 = scalar_lea.vmem [#allocation3], %s796_s5 }
  0x5c   : > { %2000 = sst [smem:[#allocation30_spill]] %s1999_s30  ;;  %s252_s1 = sshll.u32 %s245_s26, 4  ;;  %s1677_s1 = int_to_ptr.vmem [resolvable:$true] %s252_s1 }
  0x5d   : > { %p2001_p7 = scmp.lt.s32.totalorder %s1393_s10, 8  ;;  %s802_s9 = sshll.u32 %s1385_s8, 7 }
  0x5e   : > { %s1683_s18 = scalar_lea.hbm %s1940_s3, %s802_s9  ;;  %s242_s29 = scalar_lea.sflag [#allocation4], %s241_s6 }
  0x5f   : > { %p1673_p1 = pnand %p2001_p7, %p1598_p6  ;;  %s1151_s5 = scalar_lea.hbm %s1667_s7, 128 }
  0x60   : > { %p1152_p4 = scmp.ne.s32.totalorder %s1667_s7, %s1151_s5  ;;  %s1156_s30 = scalar_lea.hbm %s1937_s0, 256 }
  0x61   : > { %p1153_p10 = pneg %p1673_p1  ;;  %p1157_p13 = scmp.lt.u32.totalorder %s1667_s7, %s1937_s0 }
  0x62   : > { %p1158_p7 = scmp.lt.u32.totalorder %s1156_s30, %s1151_s5  ;;  %p1160_p3 = scmp.lt.u32.totalorder %s1151_s5, %s1667_s7 }
  0x63   : > { %p1154_p6 = pnand %p1153_p10, %p1152_p4 }
  0x64   : > { %p1159_p2 = por %p1158_p7, %p1157_p13 }
  0x65   : > { %p1155_p12 = pneg %p1154_p6 }
  0x66   : > { %p1161_p0 = por %p1160_p3, %p1159_p2 }
  0x68   : > { %p1162_p8 = pnand %p1161_p0, %p1155_p12 }
  0x6a   : > { %1165 = shalt.err (!%p1162_p8)
}
  0x6b   : > { %s1166_s9 = scalar_lea.vmem %s1677_s1, 128  ;;  %s1398_s6 = smov [#allocation3]  }
  0x6c   : > { %p1167_p4 = scmp.ne.s32.totalorder %s1677_s1, %s1166_s9  ;;  %s1171_s16 = sshll.u32 %s1398_s6, 4  ;;  %s1172_s16 = int_to_ptr.vmem [resolvable:$false] %s1171_s16 }
  0x6d   : > { %s1173_s27 = scalar_lea.vmem %s1172_s16, 256  ;;  %p1174_p9 = scmp.lt.s32.totalorder %s1677_s1, %s1172_s16 }
  0x6e   : > { %p1169_p6 = pnand %p1167_p4, %p1153_p10  ;;  %p1175_p13 = scmp.lt.s32.totalorder %s1173_s27, %s1166_s9 }
  0x70   : > { %p1170_p11 = pneg %p1169_p6  ;;  %p1176_p7 = por %p1175_p13, %p1174_p9 }
  0x72   : > { %p1177_p2 = pnand %p1176_p7, %p1170_p11 }
  0x74   : > { %1180 = shalt.err (!%p1177_p2)
}
  0x75   : > { %987 = dma.hbm_to_vmem [thread:$0]  (!%p1673_p1), %s1667_s7, 128, %s1677_s1, %s242_s29  }
  0x76   : > { %s1181_s8 = scalar_lea.hbm %s1683_s18, 2048  ;;  %p2003_p0 = pneg %p1533_p5 }
  0x77   : > { %p1182_p8 = scmp.ne.s32.totalorder %s1683_s18, %s1181_s8  ;;  %s1186_s5 = scalar_lea.hbm %s1940_s3, 8192 }
  0x78   : > { %p1187_p9 = scmp.lt.u32.totalorder %s1683_s18, %s1940_s3  ;;  %p1188_p11 = scmp.lt.u32.totalorder %s1186_s5, %s1181_s8 }
  0x79   : > { %p1184_p3 = pnand %p1182_p8, %p2003_p0  ;;  %p1190_p4 = scmp.lt.u32.totalorder %s1181_s8, %s1683_s18 }
  0x7a   : > { %p1189_p12 = por %p1188_p11, %p1187_p9 }
  0x7b   : > { %p1185_p10 = pneg %p1184_p3 }
  0x7c   : > { %p1191_p6 = por %p1190_p4, %p1189_p12 }
  0x7e   : > { %p1192_p13 = pnand %p1191_p6, %p1185_p10 }
  0x80   : > { %1195 = shalt.err (!%p1192_p13)
}
  0x81   : > { %s1196_s29 = scalar_lea.vmem %s1573_s12, 2048  ;;  %p2004_p7 = pmov %p2003_p0 }
  0x82   : > { %p1197_p1 = scmp.ne.s32.totalorder %s1573_s12, %s1196_s29  ;;  %s1399_s7 = smov [#allocation8]  }
  0x83   : > { %s1201_s1 = sshll.u32 %s1399_s7, 4  ;;  %s1202_s1 = int_to_ptr.vmem [resolvable:$false] %s1201_s1 }
  0x84   : > { %p1199_p2 = pnand %p1197_p1, %p2004_p7  ;;  %s1203_s19 = scalar_lea.vmem %s1202_s1, 4096 }
  0x85   : > { %p1204_p0 = scmp.lt.s32.totalorder %s1573_s12, %s1202_s1  ;;  %p1205_p3 = scmp.lt.s32.totalorder %s1203_s19, %s1196_s29 }
  0x86   : > { %p1200_p8 = pneg %p1199_p2 }
  0x87   : > { %p1206_p9 = por %p1205_p3, %p1204_p0 }
  0x89   : > { %p1207_p11 = pnand %p1206_p9, %p1200_p8 }
  0x8b   : > { %1210 = shalt.err (!%p1207_p11)
}
  0x8c   : > { %s1400_s9 = smov 512   ;;  %s2005_s6 = smov 8  }
  0x8d   : > { %s2006_s16 = smov 128   ;;  %p2007_p10 = scmp.ne.s32.totalorder %s1983_s15, 0 }
  0x8e   : > { %993 = dma.hbm_to_vmem [thread:$0]  (!%p1533_p5), %s1683_s18, 2048, %s1573_s12, %s1539_s13, %s1400_s9, %s2006_s16, %s2005_s6  }
  0x8f   : > { %308 = sbr.rel (%p2007_p10) target bundleno = 738 (0x2e2), region = 40  ;;  %s2008_s27 = sld [smem:[#allocation25_spill]] (!%p2007_p10) }
  0x90   : > { %s1739_s8 = sand.u32 (!%p2007_p10), 1, %s1369_s28  }
  0x91   : > { %s804_s30 = sshll.u32 (!%p2007_p10), %s1739_s8, 3  ;;  %s311_s14 = scalar_lea.sflag (!%p2007_p10), [#allocation4], %s1739_s8 }
  0x92   : > { %s1745_s11 = scalar_lea.vmem (!%p2007_p10), [#allocation3], %s804_s30 }
  0x95   : > { %p2009_p12 = scmp.ne.s32.totalorder (!%p2007_p10), %s2008_s27, 0 }
  0x97   : > { %1324 = dma.done.wait (%p2009_p12), %s311_s14, 128  }
  0x98   : > { %1326 = vsyncadd (%p2009_p12), %s311_s14, 4294967168  ;;  %s319_s13 = sand.u32 1, %s1580_s17   ;;  %s321_s12 = sand.u32 1, %s1357_s25  }
  0x99   : > { %s805_s15 = sshll.u32 %s321_s12, 7  ;;  %s320_s18 = scalar_lea.sflag [#allocation7], %s319_s13 }
  0x9a   : > { %s1753_s5 = scalar_lea.vmem [#allocation6], %s805_s15  ;;  %p2010_p5 = scmp.ne.s32.totalorder %s1992_s20, 0 }
  0x9c   : > { %1328 = dma.done.wait (%p2010_p5), %s320_s18, 4096  }
  0x9d   : > { %1330 = vsyncadd (%p2010_p5), %s320_s18, 4294963200  ;;  %v1401_v0 = vmov 0.0|0.0   ;;  %vm1402_vm0 = vmmov 0   ;;  %v1403_v1 = vmov 0.0   ;;  %v384_v2 = vld [vmem:[%s1753_s5] sm:$0xff]  ;;  %v385_v3 = vld [vmem:[%s1753_s5 + $0x8] sm:$0xff] }
  0x9e   : > { %926 = vmatprep.subr.bf16.mxu0 %v1401_v0  ;;  %888 = vmatprep.mubr.msk.f32.mxu0 %vm1402_vm0, %v1403_v1  ;;  %v927_v4 = vpack.c.bf16 %v385_v3, %v384_v2  ;;  %v386_v5 = vld [vmem:[%s1753_s5 + $0x10] sm:$0xff]  ;;  %v387_v6 = vld [vmem:[%s1753_s5 + $0x18] sm:$0xff]  ;;  %s1766_s17 = scalar_lea.vmem [#allocation8], %s805_s15  ;;  %v388_v13 = vld [vmem:[%s1753_s5 + $0x20] sm:$0xff]  ;;  %s2011_s20 = sld [smem:[#allocation20_spill]] }
  0x9f   : > { %950 = vmatprep.subr.bf16.mxu1 %v1401_v0  ;;  %923 = vmatprep.mubr.msk.f32.mxu1 %vm1402_vm0, %v1403_v1  ;;  %v479_v7 = vld [vmem:[%s1766_s17] sm:$0xff]  ;;  %v480_v8 = vld [vmem:[%s1766_s17 + $0x8] sm:$0xff]  ;;  %v930_v9 = vpack.c.bf16 %v387_v6, %v386_v5  ;;  %v481_v11 = vld [vmem:[%s1766_s17 + $0x10] sm:$0xff]  ;;  %s2012_s7 = sld [smem:[#allocation32_spill]]  ;;  %s369_s19 = sand.u32 1, %s1345_s22  }
  0xa0   : > { %928 = vmatpush3.bf16.xpose.msra.mxu0 %v927_v4  ;;  %v951_v10 = vpack.c.bf16 %v480_v8, %v479_v7  ;;  %v482_v12 = vld [vmem:[%s1766_s17 + $0x18] sm:$0xff]  ;;  %v389_v14 = vld [vmem:[%s1753_s5 + $0x28] sm:$0xff]  ;;  %v483_v17 = vld [vmem:[%s1766_s17 + $0x20] sm:$0xff]  ;;  %s1818_s9 = sshll.u32 %s369_s19, 3  ;;  %s1823_s16 = scalar_lea.vmem [#allocation10], %s804_s30 }
  0xa1   : > { %929 = vmatprep.subr.bf16.mxu0 %v1401_v0  ;;  %v954_v15 = vpack.c.bf16 %v482_v12, %v481_v11  ;;  %v933_v16 = vpack.c.bf16 %v389_v14, %v388_v13  ;;  %v484_v18 = vld [vmem:[%s1766_s17 + $0x28] sm:$0xff]  ;;  %v390_v19 = vld [vmem:[%s1753_s5 + $0x30] sm:$0xff]  ;;  %v391_v20 = vld [vmem:[%s1753_s5 + $0x38] sm:$0xff]  ;;  %s371_s6 = scalar_lea.vmem [#allocation9], %s1818_s9 }
  0xa2   : > { %952 = vmatpush3.bf16.xpose.msra.mxu1 %v951_v10  ;;  %v957_v21 = vpack.c.bf16 %v484_v18, %v483_v17  ;;  %v936_v22 = vpack.c.bf16 %v391_v20, %v390_v19  ;;  %v485_v23 = vld [vmem:[%s1766_s17 + $0x30] sm:$0xff]  ;;  %v486_v24 = vld [vmem:[%s1766_s17 + $0x38] sm:$0xff]  ;;  %v392_v25 = vld [vmem:[%s1753_s5 + $0x40] sm:$0xff] }
  0xa3   : > { %953 = vmatprep.subr.bf16.mxu1 %v1401_v0  ;;  %v393_v26 = vld [vmem:[%s1753_s5 + $0x48] sm:$0xff]  ;;  %v960_v27 = vpack.c.bf16 %v486_v24, %v485_v23  ;;  %v487_v29 = vld [vmem:[%s1766_s17 + $0x40] sm:$0xff]  ;;  %v394_v31 = vld [vmem:[%s1753_s5 + $0x50] sm:$0xff] }
  0xa4   : > { %v939_v28 = vpack.c.bf16 %v393_v26, %v392_v25  ;;  %v488_v30 = vld [vmem:[%s1766_s17 + $0x48] sm:$0xff]  ;;  %v395_v32 = vld [vmem:[%s1753_s5 + $0x58] sm:$0xff]  ;;  %v489_v35 = vld [vmem:[%s1766_s17 + $0x50] sm:$0xff]  ;;  %p380_p4 = scmp.lt.s32.totalorder %s2011_s20, 3  ;;  %p810_p6 = scmp.ne.s32.totalorder %s2011_s20, 0 }
  0xa5   : > { %v963_v33 = vpack.c.bf16 %v488_v30, %v487_v29  ;;  %v942_v34 = vpack.c.bf16 %v395_v32, %v394_v31  ;;  %v490_v36 = vld [vmem:[%s1766_s17 + $0x58] sm:$0xff]  ;;  %v396_v37 = vld [vmem:[%s1753_s5 + $0x60] sm:$0xff]  ;;  %v397_v38 = vld [vmem:[%s1753_s5 + $0x68] sm:$0xff] }
  0xa6   : > { %v966_v39 = vpack.c.bf16 %v490_v36, %v489_v35  ;;  %v945_v40 = vpack.c.bf16 %v397_v38, %v396_v37  ;;  %v491_v41 = vld [vmem:[%s1766_s17 + $0x60] sm:$0xff]  ;;  %v492_v42 = vld [vmem:[%s1766_s17 + $0x68] sm:$0xff]  ;;  %v398_v43 = vld [vmem:[%s1753_s5 + $0x70] sm:$0xff]  ;;  %s381_s26 = scalar_select %p380_p4, %s2011_s20, 3 }
  0xa7   : > { %v399_v44 = vld [vmem:[%s1753_s5 + $0x78] sm:$0xff]  ;;  %v969_v45 = vpack.c.bf16 %v492_v42, %v491_v41  ;;  %v493_v47 = vld [vmem:[%s1766_s17 + $0x70] sm:$0xff] }
  0xa8   : > { %931 = vmatpush3.bf16.xpose.msra.mxu0 %v930_v9  ;;  %v948_v46 = vpack.c.bf16 %v399_v44, %v398_v43  ;;  %v494_v48 = vld [vmem:[%s1766_s17 + $0x78] sm:$0xff]  ;;  %s382_s1 = scalar_lea.vmem %s2012_s7, %s381_s26 }
  0xa9   : > { %932 = vmatprep.subr.bf16.mxu0 %v1401_v0  ;;  %v972_v49 = vpack.c.bf16 %v494_v48, %v493_v47  ;;  %v383_v50 = vld [vmem:[%s1745_s11] sm:$0xff]  ;;  %v809_v51 = vld [vmem:[%s382_s1] ss:$0 sm:$0xff]  ;;  %s2013_s11 = sld [smem:[#allocation33_spill]] (!%p810_p6) }
  0xaa   : > { %955 = vmatpush3.bf16.xpose.msra.mxu1 %v954_v15 }
  0xab   : > { %956 = vmatprep.subr.bf16.mxu1 %v1401_v0 }
  0xaf   : > { %v811_v58 = vld [vmem:[%s2013_s11] ss:$0 sm:$0xff] (!%p810_p6) }
  0xb0   : > { %934 = vmatpush3.bf16.xpose.msra.mxu0 %v933_v16 }
  0xb1   : > { %935 = vmatprep.subr.bf16.mxu0 %v1401_v0 }
  0xb2   : > { %958 = vmatpush3.bf16.xpose.msra.mxu1 %v957_v21 }
  0xb3   : > { %959 = vmatprep.subr.bf16.mxu1 %v1401_v0 }
  0xb8   : > { %937 = vmatpush3.bf16.xpose.msra.mxu0 %v936_v22 }
  0xb9   : > { %938 = vmatprep.subr.bf16.mxu0 %v1401_v0 }
  0xba   : > { %961 = vmatpush3.bf16.xpose.msra.mxu1 %v960_v27 }
  0xbb   : > { %962 = vmatprep.subr.bf16.mxu1 %v1401_v0 }
  0xc0   : > { %940 = vmatpush3.bf16.xpose.msra.mxu0 %v939_v28 }
  0xc1   : > { %941 = vmatprep.subr.bf16.mxu0 %v1401_v0 }
  0xc2   : > { %964 = vmatpush3.bf16.xpose.msra.mxu1 %v963_v33 }
  0xc3   : > { %965 = vmatprep.subr.bf16.mxu1 %v1401_v0 }
  0xc8   : > { %943 = vmatpush3.bf16.xpose.msra.mxu0 %v942_v34 }
  0xc9   : > { %944 = vmatprep.subr.bf16.mxu0 %v1401_v0 }
  0xca   : > { %967 = vmatpush3.bf16.xpose.msra.mxu1 %v966_v39 }
  0xcb   : > { %968 = vmatprep.subr.bf16.mxu1 %v1401_v0 }
  0xd0   : > { %946 = vmatpush3.bf16.xpose.msra.mxu0 %v945_v40 }
  0xd1   : > { %947 = vmatprep.subr.bf16.mxu0 %v1401_v0 }
  0xd2   : > { %970 = vmatpush3.bf16.xpose.msra.mxu1 %v969_v45 }
  0xd3   : > { %971 = vmatprep.subr.bf16.mxu1 %v1401_v0 }
  0xd8   : > { %949 = vmatpush3.bf16.xpose.msra.mxu0 %v948_v46 }
  0xda   : > { %973 = vmatpush3.bf16.xpose.msra.mxu1 %v972_v49 }
  0xdf   : > { %889 = vmatmul.mubr.f32.vlgmr.msra.gmra.mrb[0].mxu0 %v383_v50 }
 0x1b2   : > { %v473_v52 = vpop.f32.mrb[0].mxu0 }
 0x1b3   : > { %v474_v53 = vadd.f32 %v809_v51, %v473_v52  ;;  %v890_v54 = vpop.f32.mrb[1].mxu0 }
 0x1b5   : > { %v477_v55 = vmax.f32 %v474_v53, 0.0 }
 0x1b7   : > { %478 = vst [vmem:[%s371_s6] sm:$0xff] %v477_v55  ;;  %924 = vmatmul.mubr.f32.vlgmr.msra.gmra.mrb[0].mxu1 %v477_v55 }
 0x285   : > { %568 = sbr.rel (%p810_p6) target bundleno = 654 (0x28e), region = 56 }
 0x28a   : > { %v561_v56 = vpop.f32.mrb[0].mxu1 }
 0x28b   : > { %v925_v57 = vpop.f32.mrb[1].mxu1  ;;  %v576_v59 = vadd.f32 (!%p810_p6), %v811_v58, %v561_v56 }
 0x28d   : > { %577 = vst [vmem:[#allocation2] sm:$0xff] %v576_v59 }
 0x28e PF: > { %s2014_s13 = sld [smem:[#allocation20_spill]] }
 0x294   : > { %p812_p13 = scmp.le.s32.totalorder %s2014_s13, 0 }
 0x295   : > { %v582_v60 = vld [vmem:[#allocation2] sm:$0xff] (!%p812_p13) }
 0x296   : > { %581 = sbr.rel (%p812_p13) target bundleno = 669 (0x29d), region = 60  ;;  %v583_v61 = vadd.f32 (!%p812_p13), %v582_v60, %v561_v56 }
 0x298   : > { %584 = vst [vmem:[#allocation2] sm:$0xff] (!%p812_p13), %v583_v61 }
 0x29d PF: > { %s2015_s12 = sld [smem:[#allocation20_spill]] }
 0x2a3   : > { %p813_p1 = scmp.ne.s32.totalorder %s2015_s12, 3 }
 0x2a4   : > { %v589_v62 = vld [vmem:[#allocation2] sm:$0xff] (!%p813_p1) }
 0x2a5   : > { %588 = sbr.rel (%p813_p1) target bundleno = 684 (0x2ac), region = 64  ;;  %590 = vst [vmem:[%s1823_s16] sm:$0xff] (!%p813_p1), %v589_v62 }
 0x2ac PF: > { %s2016_s30 = sld [smem:[#allocation21_spill]]  ;;  %s2017_s15 = sld [smem:[#allocation20_spill]] }
 0x2ad   : > { %s612_s17 = sshll.u32 %s371_s6, 4  ;;  %s2018_s29 = sld [smem:[#allocation34_spill]]  ;;  %s1834_s17 = int_to_ptr.vmem [resolvable:$true] %s612_s17 }
 0x2ae   : > { %s592_s9 = scalar_lea.sflag [#allocation5], %s369_s19  ;;  %s1211_s27 = scalar_lea.vmem %s1834_s17, 128 }
 0x2af   : > { %p1212_p7 = scmp.ne.s32.totalorder %s1834_s17, %s1211_s27  ;;  %p2020_p2 = scmp.ne.s32.totalorder %s1995_s24, 0 }
 0x2b0   : > { %s1404_s14 = smov [#allocation9]  }
 0x2b1   : > { %p1213_p8 = pnand %p1212_p7, %p2020_p2  ;;  %s1215_s11 = sshll.u32 %s1404_s14, 4  ;;  %s1216_s11 = int_to_ptr.vmem [resolvable:$false] %s1215_s11 }
 0x2b2   : > { %s816_s18 = sshll.u32 %s2016_s30, 2  ;;  %s1217_s6 = scalar_lea.vmem %s1216_s11, 256 }
 0x2b3   : > { %s608_s5 = sadd.s32 %s2017_s15, %s816_s18  ;;  %s2019_s1 = smov %s2018_s29 }
 0x2b4   : > { %s817_s20 = sshll.u32 %s608_s5, 7  ;;  %p1214_p0 = pneg %p1213_p8 }
 0x2b5   : > { %s610_s7 = scalar_lea.hbm %s2018_s29, %s817_s20  ;;  %p1218_p3 = scmp.lt.s32.totalorder %s1834_s17, %s1216_s11 }
 0x2b6   : > { %p1219_p9 = scmp.lt.s32.totalorder %s1217_s6, %s1211_s27 }
 0x2b8   : > { %p1220_p11 = por %p1219_p9, %p1218_p3 }
 0x2ba   : > { %p1221_p10 = pnand %p1220_p11, %p1214_p0 }
 0x2bc   : > { %1224 = shalt.err (!%p1221_p10)
}
 0x2bd   : > { %s1225_s13 = scalar_lea.hbm %s610_s7, 128  ;;  %s1229_s15 = scalar_lea.hbm %s2019_s1, 1024 }
 0x2be   : > { %p1226_p12 = scmp.ne.s32.totalorder %s610_s7, %s1225_s13  ;;  %p1230_p6 = scmp.lt.u32.totalorder %s610_s7, %s2019_s1 }
 0x2bf   : > { %p1231_p13 = scmp.lt.u32.totalorder %s1229_s15, %s1225_s13  ;;  %p1233_p7 = scmp.lt.u32.totalorder %s1225_s13, %s610_s7 }
 0x2c0   : > { %p1227_p5 = pnand %p1226_p12, %p2020_p2 }
 0x2c1   : > { %p1232_p1 = por %p1231_p13, %p1230_p6 }
 0x2c2   : > { %p1228_p4 = pneg %p1227_p5 }
 0x2c3   : > { %p1234_p8 = por %p1233_p7, %p1232_p1 }
 0x2c5   : > { %p1235_p0 = pnand %p1234_p8, %p1228_p4 }
 0x2c7   : > { %1238 = shalt.err (!%p1235_p0)
}
 0x2c8   : > { %980 = dma.vmem_to_hbm [thread:$0]  (%p2020_p2), %s1834_s17, 128, %s610_s7, %s592_s9  }
 0x2c9   : > { %s818_s20 = sshll.u32 %s2016_s30, 7  ;;  %s625_s26 = sshll.u32 %s1823_s16, 4  ;;  %s626_s26 = int_to_ptr.vmem [resolvable:$true] %s625_s26 }
 0x2ca   : > { %s2021_s27 = sld [smem:[#allocation35_spill]]  ;;  %s597_s6 = scalar_lea.sflag [#allocation11], %s1739_s8 }
 0x2cb   : > { %s1239_s13 = scalar_lea.vmem %s626_s26, 128  ;;  %p2023_p9 = scmp.ne.s32.totalorder %s1996_s4, 0 }
 0x2cc   : > { %p1240_p3 = scmp.ne.s32.totalorder %s626_s26, %s1239_s13  ;;  %s1405_s24 = smov [#allocation10]  }
 0x2cd   : > { %s1243_s19 = sshll.u32 %s1405_s24, 4  ;;  %s1244_s19 = int_to_ptr.vmem [resolvable:$false] %s1243_s19 }
 0x2ce   : > { %p1241_p11 = pnand %p1240_p3, %p2023_p9  ;;  %s1245_s12 = scalar_lea.vmem %s1244_s19, 256 }
 0x2cf   : > { %p1246_p12 = scmp.lt.s32.totalorder %s626_s26, %s1244_s19  ;;  %p1247_p2 = scmp.lt.s32.totalorder %s1245_s12, %s1239_s13 }
 0x2d0   : > { %s2022_s14 = smov %s2021_s27  ;;  %s1862_s11 = scalar_lea.hbm %s2021_s27, %s818_s20 }
 0x2d1   : > { %p1242_p10 = pneg %p1241_p11  ;;  %p1248_p5 = por %p1247_p2, %p1246_p12 }
 0x2d3   : > { %p1249_p4 = pnand %p1248_p5, %p1242_p10 }
 0x2d5   : > { %1252 = shalt.err (!%p1249_p4)
}
 0x2d6   : > { %s1253_s8 = scalar_lea.hbm %s1862_s11, 128  ;;  %s1257_s17 = scalar_lea.hbm %s2022_s14, 256 }
 0x2d7   : > { %p1254_p6 = scmp.ne.s32.totalorder %s1862_s11, %s1253_s8  ;;  %p1258_p7 = scmp.lt.u32.totalorder %s1862_s11, %s2022_s14 }
 0x2d8   : > { %p1259_p8 = scmp.lt.u32.totalorder %s1257_s17, %s1253_s8  ;;  %p1261_p3 = scmp.lt.u32.totalorder %s1253_s8, %s1862_s11 }
 0x2d9   : > { %p1255_p13 = pnand %p1254_p6, %p2023_p9 }
 0x2da   : > { %p1260_p0 = por %p1259_p8, %p1258_p7 }
 0x2db   : > { %p1256_p1 = pneg %p1255_p13 }
 0x2dc   : > { %p1262_p11 = por %p1261_p3, %p1260_p0 }
 0x2de   : > { %p1263_p10 = pnand %p1262_p11, %p1256_p1 }
 0x2e0   : > { %1266 = shalt.err (!%p1263_p10)
}
 0x2e1   : > { %981 = dma.vmem_to_hbm [thread:$0]  (%p2023_p9), %s626_s26, 128, %s1862_s11, %s597_s6  }
 0x2e2 PF: > { %p1002_p12 = scmp.ge.s32.totalorder %s1393_s10, 2  ;;  %s637_s15 = sand.u32 1, %s1341_s21  }
 0x2e3   : > { %p2024_p2 = scmp.ne.s32.totalorder %s1997_s2, 0  ;;  %s638_s18 = scalar_lea.sflag [#allocation5], %s637_s15 }
 0x2e5   : > { %p995_p5 = pnand %p1002_p12, %p2024_p2 }
 0x2e7   : > { %1332 = dma.done.wait (!%p995_p5), %s638_s18, 128  }
 0x2e8   : > { %1334 = vsyncadd (!%p995_p5), %s638_s18, 4294967168  ;;  %s2025_s5 = sld [smem:[#allocation18_spill]]  ;;  %s2026_s20 = sld [smem:[#allocation30_spill]] }
 0x2ee   : > { %s646_s23 = sand.u32 1, %s2025_s5   ;;  %p2027_p4 = scmp.ne.s32.totalorder %s2026_s20, 0 }
 0x2ef   : > { %s647_s29 = scalar_lea.sflag [#allocation11], %s646_s23 }
 0x2f0   : > { %p998_p6 = pnand %p1002_p12, %p2027_p4 }
 0x2f2   : > { %1336 = dma.done.wait (!%p998_p6), %s647_s29, 128  }
 0x2f3   : > { %1338 = vsyncadd (!%p998_p6), %s647_s29, 4294967168  ;;  %s29_s10 = sadd.s32 1, %s1393_s10   ;;  %s2029_s2 = sld [smem:[#allocation16_spill]] }
 0x2f4   : > { %p1890_p9 = scmp.ge.s32.totalorder %s29_s10, 10   ;;  %s2030_s23 = sld [smem:[#allocation29_spill]] }
 0x2f5   : > { %s2031_s26 = sld [smem:[#allocation17_spill]]  ;;  %s2032_s27 = sld [smem:[#allocation27_spill]] }
 0x2f6   : > { %s2033_s11 = sld [smem:[#allocation19_spill]]  ;;  %s2034_s29 = sld [smem:[#allocation28_spill]] }
 0x2f7   : > { %s2035_s30 = sld [smem:[#allocation22_spill]]  ;;  %s2036_s7 = sld [smem:[#allocation23_spill]] }
 0x2f8   : > { %s2037_s8 = sld [smem:[#allocation24_spill]]  ;;  %s2038_s9 = sld [smem:[#allocation26_spill]] }
 0x2f9   : > { %s2039_s21 = smov %s1345_s22  ;;  %s2040_s22 = smov %s2029_s2 }
 0x2fa   : > { %s2041_s24 = smov %s1357_s25  ;;  %28 = sbr.rel (!%p1890_p9) target bundleno = 20 (0x14), region = 141 }
 0x2fb   : > { %s2042_s25 = smov %s2031_s26  ;;  %s2043_s26 = smov %s2032_s27 }
 0x2fc   : > { %s2044_s27 = smov %s1369_s28  ;;  %s2045_s28 = smov %s2033_s11 }
 0x301   :  { %652 = vsyncpa [#allocation4], 1 }
 0x302   :  { %654 = vsyncpa [#allocation4 + $0x1], 1 }
 0x303   :  { %655 = vsyncpa [#allocation7], 1 }
 0x304   :  { %657 = vsyncpa [#allocation7 + $0x1], 1 }
 0x305   :  { %658 = vsyncpa [#allocation5], 1 }
 0x306   :  { %660 = vsyncpa [#allocation5 + $0x1], 1 }
 0x307   :  { %661 = vsyncpa [#allocation11], 1 }
 0x308   :  { %663 = vsyncpa [#allocation11 + $0x1], 1 }

</bundles_post_ra>
